<compile_context>
chip_gen: v7x
topology: tpu7x:2x2x1
jax: 0.10.0
libtpu: 0.0.40
codegen_flags: <defaults>
</compile_context>

<pallas_src>
import jax
import jax.numpy as jnp
from jax.experimental import pallas as pl
from jax.experimental.pallas import tpu as pltpu

# constants from the original module
N_time = 10
N_sensors = 10
space_range = 10
time_range = 10
noise = 0.01
jitter = noise


def _round_up(x, m):
    return ((x + m - 1) // m) * m


# ---------------------------------------------------------------------------
# Pallas kernel 1: squared-exponential cross-covariance (VPU broadcast-difference)
#   K[i, j] = exp(log_scale - (xi0 - xj0)^2/ls0^2 - (xi1 - xj1)^2/ls1^2)
# Left points come in as rows (R_pad, 2); right points come pre-transposed as
# (2, C_pad) so the whole body is VPU broadcasts + one EUP exp.  No MXU: a d=2
# contraction would leave the MXU ~99% idle, and the norm-expansion form has a
# catastrophic-cancellation path near the diagonal.  The output scale is folded
# into the exponent (scale * exp(-d2) == exp(log_scale - d2)).
# ---------------------------------------------------------------------------
def _kcross_kernel(x_ref, x2t_ref, params_ref, out_ref):
    x = x_ref[...]                        # (R_pad, 2)
    x2t = x2t_ref[...]                    # (2, C_pad)
    s0 = params_ref[0]                    # 1 / exp(log_length_scale[0])^2
    s1 = params_ref[1]                    # 1 / exp(log_length_scale[1])^2
    log_scale = params_ref[2]
    d0 = x[:, 0:1] - x2t[0:1, :]          # (R_pad, C_pad)
    d1 = x[:, 1:2] - x2t[1:2, :]
    d2 = d0 * d0 * s0 + d1 * d1 * s1
    out_ref[...] = jnp.exp(log_scale - d2)


def k_cross_fused(X_left, X_right, log_length_scale, log_scale):
    """One lane-dense covariance block: rows = X_left points, cols = X_right points."""
    X_left = X_left.astype(jnp.float32)
    X_right = X_right.astype(jnp.float32)
    R, d = X_left.shape
    C = X_right.shape[0]
    R_pad = _round_up(R, 8)        # sublane-aligned rows
    C_pad = _round_up(C, 128)      # lane-dense columns -> unmasked vst stores
    xl = jnp.zeros((R_pad, d), jnp.float32).at[:R, :].set(X_left)
    xrt = jnp.zeros((d, C_pad), jnp.float32).at[:, :C].set(X_right.T)
    inv_ls_sq = jnp.exp(-2.0 * log_length_scale.astype(jnp.float32)).reshape(-1)
    params = jnp.concatenate(
        [inv_ls_sq, log_scale.reshape(-1).astype(jnp.float32)])
    out = pl.pallas_call(
        _kcross_kernel,
        out_shape=jax.ShapeDtypeStruct((R_pad, C_pad), jnp.float32),
        # whole problem fits one block at this size; TODO(synk): add row tiling +
        # dimension_semantics=("parallel",) before scaling n (v7x: 64 MiB VMEM, 2 TCs).
        grid=(1,),
        in_specs=[
            pl.BlockSpec((R_pad, d), lambda i: (0, 0)),
            pl.BlockSpec((d, C_pad), lambda i: (0, 0)),
            pl.BlockSpec(memory_space=pltpu.MemorySpace.SMEM),
        ],
        out_specs=pl.BlockSpec((R_pad, C_pad), lambda i: (0, 0)),
    )(xl, xrt, params)
    return out  # caller slices the valid (R, C) region (padded rows/cols are dummies)


# ---------------------------------------------------------------------------
# Pallas kernel 2: predictive mean and diagonal variance, packed lane-dense
#   mean_row = sum_i kxT[i, :] * v[i]         (v = Sigma^{-1} Y, from the solver)
#   var_row  = scale - sum_i alpha[i, :]^2    (alpha = L^{-1} kx^T)
# Both land in one (2, nt_pad) lane-dense output: row 0 = mean, row 1 = var.
# Pure VPU multiply + XLU sublane reduce; no near-empty (N=1) MXU pass.
# ---------------------------------------------------------------------------
def _post_kernel(kxt_ref, alpha_ref, v_ref, scale_ref, out_ref):
    kxt = kxt_ref[...]                                    # (n_pad, nt_pad)
    a = alpha_ref[...]                                    # (n_pad, nt_pad)
    v = v_ref[...]                                        # (n_pad, 1)
    out_ref[0:1, :] = jnp.sum(kxt * v, axis=0, keepdims=True)
    out_ref[1:2, :] = scale_ref[0] - jnp.sum(a * a, axis=0, keepdims=True)


def post_process(kxT, alpha_mat, v, log_scale):
    n, nt = kxT.shape
    n_pad = _round_up(n, 8)
    nt_pad = _round_up(nt, 128)
    kxt_p = jnp.zeros((n_pad, nt_pad), jnp.float32).at[:n, :nt].set(
        kxT.astype(jnp.float32))
    alpha_p = jnp.zeros((n_pad, nt_pad), jnp.float32).at[:n, :nt].set(
        alpha_mat.astype(jnp.float32))
    v_p = jnp.zeros((n_pad, 1), jnp.float32).at[:n, :].set(v.astype(jnp.float32))
    scale = jnp.exp(log_scale).reshape(1).astype(jnp.float32)
    out = pl.pallas_call(
        _post_kernel,
        out_shape=jax.ShapeDtypeStruct((2, nt_pad), jnp.float32),
        grid=(1,),
        in_specs=[
            pl.BlockSpec((n_pad, nt_pad), lambda i: (0, 0)),
            pl.BlockSpec((n_pad, nt_pad), lambda i: (0, 0)),
            pl.BlockSpec((n_pad, 1), lambda i: (0, 0)),
            pl.BlockSpec(memory_space=pltpu.MemorySpace.SMEM),
        ],
        out_specs=pl.BlockSpec((2, nt_pad), lambda i: (0, 0)),
    )(kxt_p, alpha_p, v_p, scale)
    mean = out[0, :nt].reshape(nt, 1)
    var_diag = out[1, :nt].reshape(nt, 1)
    return mean, var_diag


# ---------------------------------------------------------------------------
# gpr module (forward pass), parameters initialized exactly as in __init__
# ---------------------------------------------------------------------------
class GPRPallas:
    def __init__(self, X, Y):
        self.X = jnp.asarray(X, jnp.float32)          # (N_sensors*N_time, 2)
        self.Y = jnp.asarray(Y, jnp.float32)          # (N_sensors*N_time, 1)
        d = self.X.shape[1]
        self.log_beta = jnp.zeros((1,), jnp.float32)
        self.log_length_scale = jnp.zeros((d,), jnp.float32)
        self.log_scale = jnp.zeros((1,), jnp.float32)
        self.bias = jnp.zeros((N_sensors,), jnp.float32)
        self.gain = jnp.ones((1,), jnp.float32)

    def forward(self, Xte):
        Xte = jnp.asarray(Xte, jnp.float32)
        n = self.X.shape[0]
        nt = Xte.shape[0]

        # One fused covariance launch: rows = X, cols = [X ; Xte].
        # Kxx = block[:, :n], kx^T = block[:, n:n+nt]  (no transpose needed later).
        X_right = jnp.concatenate([self.X, Xte], axis=0)
        K_full = k_cross_fused(self.X, X_right, self.log_length_scale, self.log_scale)
        Kxx = K_full[:n, :n]
        kxT = K_full[:n, n:n + nt]                    # (n, nt)

        Sigma = Kxx + (jnp.exp(-self.log_beta[0]) + jitter) * jnp.eye(n, dtype=jnp.float32)

        y_bias = jnp.tile(self.bias.reshape(-1, 1), (N_time, 1))   # (n, 1)
        Yc = self.Y * self.gain - y_bias

        # TODO(synk): Cholesky factorization / triangular solves have no clean
        # Pallas equivalent; done in plain JAX (glue). All dense kernel math is Pallas.
        L = jnp.linalg.cholesky(Sigma)
        v = jax.scipy.linalg.cho_solve((L, True), Yc)                      # Sigma^{-1} Yc
        alpha_mat = jax.scipy.linalg.solve_triangular(L, kxT, lower=True)  # L^{-1} kx^T

        mean, var_diag = post_process(kxT, alpha_mat, v, self.log_scale)
        return mean, var_diag


# ---------------------------------------------------------------------------
# pure-JAX reference (mirrors the PyTorch module exactly, expansion form)
# ---------------------------------------------------------------------------
def reference_forward(model, Xte):
    ls = jnp.exp(model.log_length_scale).reshape(1, -1)

    def kc(A, B):
        A = A / ls
        B = B / ls
        An = jnp.sum(A * A, axis=1, keepdims=True)
        Bn = jnp.sum(B * B, axis=1, keepdims=True)
        K = -2.0 * A @ B.T + An + Bn.T
        return jnp.exp(model.log_scale) * jnp.exp(-K)

    n = model.X.shape[0]
    Sigma = kc(model.X, model.X) + (jnp.exp(-model.log_beta[0]) + jitter) * jnp.eye(n)
    kx = kc(Xte, model.X)
    y_bias = jnp.tile(model.bias.reshape(-1, 1), (N_time, 1))
    Yc = model.Y * model.gain - y_bias
    L = jnp.linalg.cholesky(Sigma)
    v = jax.scipy.linalg.cho_solve((L, True), Yc)
    mean = kx @ v
    alpha_mat = jax.scipy.linalg.solve_triangular(L, kx.T, lower=True)
    var_diag = jnp.exp(model.log_scale) - jnp.sum(alpha_mat * alpha_mat, axis=0)[:, None]
    return mean, var_diag


if __name__ == "__main__":
    key = jax.random.PRNGKey(0)

    # training inputs, built like the original module (N_sensors x N_time grid)
    sensors = jnp.linspace(0.0, space_range, N_sensors)
    sensor_time = jnp.linspace(0.0, space_range, N_time)
    col_space = jnp.repeat(sensors, N_time)                 # outer(sensors, ones).flatten()
    col_time = jnp.tile(sensor_time, N_sensors)             # outer(time, ones).T.flatten()
    X = jnp.stack([col_space, col_time], axis=1)            # (100, 2)

    # deterministic synthetic observations Y (stands in for the GP-sampled data)
    k1, k2 = jax.random.split(key)
    Y = jax.random.normal(k1, (N_sensors * N_time, 1), dtype=jnp.float32)

    # test points: 64 random (space, time) locations
    n_test = 64
    Xte = jax.random.uniform(k2, (n_test, 2), dtype=jnp.float32,
                             minval=0.0, maxval=float(space_range))

    model = GPRPallas(X, Y)
    mean, var_diag = model.forward(Xte)
    mean = jax.block_until_ready(mean)
    var_diag = jax.block_until_ready(var_diag)

    mean_ref, var_ref = reference_forward(model, Xte)
    assert mean.shape == (n_test, 1) and var_diag.shape == (n_test, 1)
    assert jnp.allclose(mean, mean_ref, rtol=1e-3, atol=1e-3)
    assert jnp.allclose(var_diag, var_ref, rtol=1e-3, atol=1e-3)

    print("KERNEL_OK")
</pallas_src>

<mosaic_0001>
module attributes {stable_mosaic.version = 11 : i64} {
  func.func @_kcross_kernel(%arg0: i32, %arg1: memref<104x2xf32, #tpu.memory_space<vmem>>, %arg2: memref<2x256xf32, #tpu.memory_space<vmem>>, %arg3: memref<3xf32, #tpu.memory_space<smem>>, %arg4: memref<104x256xf32, #tpu.memory_space<vmem>>) attributes {dimension_semantics = [#tpu.dimension_semantics<arbitrary>], iteration_bounds = array<i64: 1>, scalar_prefetch = 0 : i64, scratch_operands = 0 : i64, tpu.core_type = #tpu.core_type<tc>, window_params = [{pipeline_mode = #tpu.pipeline_mode<synchronous>, transform_indices = @transform_0, window_bounds = array<i64: 104, 2>}, {pipeline_mode = #tpu.pipeline_mode<synchronous>, transform_indices = @transform_1, window_bounds = array<i64: 2, 256>}, {transform_indices = @transform_2, window_bounds = array<i64: 3>}, {pipeline_mode = #tpu.pipeline_mode<synchronous>, transform_indices = @transform_3, window_bounds = array<i64: 104, 256>}]} {
    %c0 = arith.constant 0 : index
    %c0_0 = arith.constant 0 : index
    %0 = vector.load %arg1[%c0, %c0_0] : memref<104x2xf32, #tpu.memory_space<vmem>>, vector<104x2xf32>
    %c0_1 = arith.constant 0 : index
    %c0_2 = arith.constant 0 : index
    %1 = vector.load %arg2[%c0_1, %c0_2] : memref<2x256xf32, #tpu.memory_space<vmem>>, vector<2x256xf32>
    %c0_3 = arith.constant 0 : index
    %2 = memref.load %arg3[%c0_3] : memref<3xf32, #tpu.memory_space<smem>>
    %c1 = arith.constant 1 : index
    %3 = memref.load %arg3[%c1] : memref<3xf32, #tpu.memory_space<smem>>
    %c2 = arith.constant 2 : index
    %4 = memref.load %arg3[%c2] : memref<3xf32, #tpu.memory_space<smem>>
    %5 = vector.extract_strided_slice %0 {offsets = [0, 0], sizes = [104, 1], strides = [1, 1]} : vector<104x2xf32> to vector<104x1xf32>
    %6 = vector.extract_strided_slice %1 {offsets = [0, 0], sizes = [1, 256], strides = [1, 1]} : vector<2x256xf32> to vector<1x256xf32>
    %7 = vector.broadcast %5 : vector<104x1xf32> to vector<104x256xf32>
    %8 = vector.broadcast %6 : vector<1x256xf32> to vector<104x256xf32>
    %9 = arith.subf %7, %8 : vector<104x256xf32>
    %10 = vector.extract_strided_slice %0 {offsets = [0, 1], sizes = [104, 1], strides = [1, 1]} : vector<104x2xf32> to vector<104x1xf32>
    %11 = vector.extract_strided_slice %1 {offsets = [1, 0], sizes = [1, 256], strides = [1, 1]} : vector<2x256xf32> to vector<1x256xf32>
    %12 = vector.broadcast %10 : vector<104x1xf32> to vector<104x256xf32>
    %13 = vector.broadcast %11 : vector<1x256xf32> to vector<104x256xf32>
    %14 = arith.subf %12, %13 : vector<104x256xf32>
    %15 = arith.mulf %9, %9 : vector<104x256xf32>
    %16 = vector.broadcast %2 : f32 to vector<104x256xf32>
    %17 = arith.mulf %15, %16 : vector<104x256xf32>
    %18 = arith.mulf %14, %14 : vector<104x256xf32>
    %19 = vector.broadcast %3 : f32 to vector<104x256xf32>
    %20 = arith.mulf %18, %19 : vector<104x256xf32>
    %21 = arith.addf %17, %20 : vector<104x256xf32>
    %22 = vector.broadcast %4 : f32 to vector<104x256xf32>
    %23 = arith.subf %22, %21 : vector<104x256xf32>
    %24 = math.exp %23 : vector<104x256xf32>
    %c0_4 = arith.constant 0 : index
    %c0_5 = arith.constant 0 : index
    %25 = vector.load %arg4[%c0_4, %c0_5] : memref<104x256xf32, #tpu.memory_space<vmem>>, vector<104x256xf32>
    tpu.vector_store %arg4[%c0_4, %c0_5], %24 {strides = array<i32>} : memref<104x256xf32, #tpu.memory_space<vmem>>, vector<104x256xf32>,
    return
  }
  func.func @transform_0(%arg0: i32) -> (i32, i32) {
    %c0_i32 = arith.constant 0 : i32
    %c0_i32_0 = arith.constant 0 : i32
    %c0_i32_1 = arith.constant 0 : i32
    return %c0_i32, %c0_i32_0 : i32, i32
  }
  func.func @transform_1(%arg0: i32) -> (i32, i32) {
    %c0_i32 = arith.constant 0 : i32
    %c0_i32_0 = arith.constant 0 : i32
    %c0_i32_1 = arith.constant 0 : i32
    return %c0_i32, %c0_i32_0 : i32, i32
  }
  func.func @transform_2(%arg0: i32) -> i32 {
    %c0_i32 = arith.constant 0 : i32
    %c0_i32_0 = arith.constant 0 : i32
    return %c0_i32 : i32
  }
  func.func @transform_3(%arg0: i32) -> (i32, i32) {
    %c0_i32 = arith.constant 0 : i32
    %c0_i32_0 = arith.constant 0 : i32
    %c0_i32_1 = arith.constant 0 : i32
    return %c0_i32, %c0_i32_0 : i32, i32
  }
}

</mosaic_0001>

<bundles_post_ra>
// kernel: tpu_custom_call.1
= control target key start
LH: loop header
LB: loop body
LE: loop exit
PB: predicated region body
PF: predicated region fallthrough
CT: control target
= control target key end

     0   :  { %8 = vsyncpa [#allocation4], 0  ;;  %s912_s0 = inlined_call_operand.vmem [shape: f32[104,2], index: 0, kind: input, shape index: {}]   ;;  %s913_s1 = inlined_call_operand.vmem [shape: f32[2,256], index: 1, kind: input, shape index: {}]   ;;  %s914_s2 = inlined_call_operand.vmem [shape: f32[3], index: 2, kind: input, shape index: {}]   ;;  %s915_s3 = inlined_call_operand.hbm [shape: f32[104,256], index: 3, kind: output, shape index: {}]  }
   0x1   :  { %9 = vsyncpa [#allocation3], 0  ;;  %s20_s14 = sshll.u32 %s914_s2, 4  ;;  %s21_s14 = int_to_ptr.vmem [resolvable:$true] %s20_s14 }
   0x2   :  { %s569_s15 = scalar_lea.vmem %s21_s14, 16  ;;  %p574_p1 = scmp.lt.s32.totalorder %s21_s14, %s21_s14 }
   0x3   :  { %p570_p0 = scmp.ne.s32.totalorder %s21_s14, %s569_s15  ;;  %p575_p2 = scmp.lt.s32.totalorder %s569_s15, %s569_s15 }
   0x5   :  { %p576_p3 = por %p575_p2, %p574_p1 }
   0x7   :  { %p577_p4 = pnand %p576_p3, %p570_p0 }
   0x9   :  { %580 = shalt.err (!%p577_p4)
}
   0xa   :  { %s607_s16 = smov [#allocation2]  }
   0xb   :  { %23 = dma.vmem_to_smem %s21_s14, 16, %s607_s16, [#allocation4]  }
   0xc   :  { %603 = dma.done.wait [#allocation4], 16  }
   0xd   :  { %604 = vsyncadd [#allocation4], 4294967280 }
   0xe   :  { %27 = sfence }
   0xf   :  { %v30_v0 = vld [vmem:[%s912_s0 + $0x10] sm:$0xff]  ;;  %v28_v1 = vld [vmem:[%s912_s0] sm:$0xff]  ;;  %v608_v2 = vmov 0   ;;  %v31_v3 = vld [vmem:[%s912_s0 + $0x18] sm:$0xff]  ;;  %v609_v14 = vmov 1   ;;  %v111_v15 = vlaneseq  ;;  %s42_s16 = sld [smem:[#allocation2]] }
  0x10   :  { %514 = vset.pattern.permute.xlu1 %v608_v2  ;;  %513 = vset.pattern.permute.xlu0 %v608_v2  ;;  %v29_v4 = vld [vmem:[%s912_s0 + $0x8] sm:$0xff]  ;;  %v32_v6 = vld [vmem:[%s912_s0 + $0x20] sm:$0xff]  ;;  %v35_v7 = vld [vmem:[%s912_s0 + $0x38] sm:$0xff]  ;;  %s505_s17 = sld [smem:[#allocation2 + $0x1]]  ;;  %s506_s18 = sld [smem:[#allocation2 + $0x2]] }
  0x11   :  { %57 = vperm.xlu1 %514, %v30_v0   ;;  %47 = vperm.xlu0 %513, %v28_v1   ;;  %v33_v5 = vld [vmem:[%s912_s0 + $0x28] sm:$0xff]  ;;  %v34_v8 = vld [vmem:[%s912_s0 + $0x30] sm:$0xff]  ;;  %v36_v10 = vld [vmem:[%s912_s0 + $0x40] sm:$0xff]  ;;  %v112_v16 = vshrl.u32 %v111_v15, 7 }
  0x12   :  { %v37_v9 = vld [vmem:[%s912_s0 + $0x48] sm:$0xff]  ;;  %v39_v11 = vld [vmem:[%s912_s0 + $0x58] sm:$0xff]  ;;  %v38_v12 = vld [vmem:[%s912_s0 + $0x50] sm:$0xff] }
  0x13   :  { %v40_v13 = vld [vmem:[%s912_s0 + $0x60] sm:$0xff]  ;;  %v113_v17 = vsub.s32 0, %v112_v16  ;;  %v117_v18 = vsub.s32 2, %v112_v16  ;;  %v209_v28 = vsub.s32 1, %v112_v16  ;;  %v213_v29 = vsub.s32 3, %v112_v16 }
  0x14   :  { %v41_v19 = vld [vmem:[%s913_s1] sm:$0xf]  ;;  %s610_s1 = smov [#allocation5]  }
  0x15   :  { %62 = vperm.xlu1 %514, %v31_v3   ;;  %52 = vperm.xlu0 %513, %v29_v4   ;;  %v114_v20 = vrot.slane %v41_v19, %v113_v17  ;;  %v118_v21 = vrot.slane %v41_v19, %v117_v18  ;;  %v210_v36 = vrot.slane %v41_v19, %v209_v28  ;;  %v688_v42 = vstv %s42_s16  ;;  %s493_s19 = sshll.u32 %s610_s1, 4  ;;  %s494_s19 = int_to_ptr.vmem [resolvable:$true] %s493_s19 }
  0x16   :  { %v214_v37 = vrot.slane %v41_v19, %v213_v29  ;;  %v696_v51 = vstv %s505_s17  ;;  %v698_v52 = vstv %s506_s18  ;;  %s581_s20 = scalar_lea.vmem %s494_s19, 3328  ;;  %p586_p6 = scmp.lt.s32.totalorder %s494_s19, %s494_s19 }
  0x17   :  { %v678_v24 = vrot.slane %v114_v20, %v113_v17  ;;  %v680_v25 = vrot.slane %v118_v21, %v113_v17  ;;  %v692_v49 = vrot.slane %v210_v36, %v209_v28  ;;  %p582_p5 = scmp.ne.s32.totalorder %s494_s19, %s581_s20  ;;  %p587_p7 = scmp.lt.s32.totalorder %s581_s20, %s581_s20 }
  0x18   :  { %v694_v50 = vrot.slane %v214_v37, %v209_v28 }
  0x19   :  { %72 = vperm.xlu1 %514, %v33_v5   ;;  %67 = vperm.xlu0 %513, %v32_v6   ;;  %p588_p8 = por %p587_p7, %p586_p6 }
  0x1b   :  { %p589_p9 = pnand %p588_p8, %p582_p5 }
  0x1d   :  { %82 = vperm.xlu1 %514, %v35_v7   ;;  %77 = vperm.xlu0 %513, %v34_v8  }
  0x21   :  { %92 = vperm.xlu1 %514, %v37_v9   ;;  %87 = vperm.xlu0 %513, %v36_v10  }
  0x25   :  { %102 = vperm.xlu1 %514, %v39_v11   ;;  %97 = vperm.xlu0 %513, %v38_v12  }
  0x29   :  { %515 = vset.pattern.permute.xlu1 %v609_v14  ;;  %107 = vperm.xlu0 %513, %v40_v13  }
  0x2a   :  { %156 = vperm.xlu1 %515, %v28_v1  }
  0x2d   :  { %516 = vset.pattern.permute.xlu0 %v609_v14 }
  0x2e   :  { %164 = vperm.xlu1 %515, %v30_v0   ;;  %160 = vperm.xlu0 %516, %v29_v4  }
  0x32   :  { %168 = vperm.xlu1 %515, %v31_v3   ;;  %172 = vperm.xlu0 %516, %v32_v6  }
  0x36   :  { %176 = vperm.xlu1 %515, %v33_v5   ;;  %180 = vperm.xlu0 %516, %v34_v8  }
  0x3a   :  { %184 = vperm.xlu1 %515, %v35_v7   ;;  %188 = vperm.xlu0 %516, %v36_v10  }
  0x3e   :  { %192 = vperm.xlu1 %515, %v37_v9   ;;  %196 = vperm.xlu0 %516, %v38_v12  }
  0x42   :  { %200 = vperm.xlu1 %515, %v39_v11   ;;  %204 = vperm.xlu0 %516, %v40_v13  }
  0x90   :  { %v58_v22 = vpop.permute.xlu1 %57  ;;  %v48_v23 = vpop.permute.xlu0 %47 }
  0x91   :  { %v133_v30 = vsub.f32 %v58_v22, %v678_v24  ;;  %v134_v31 = vsub.f32 %v58_v22, %v680_v25  ;;  %v129_v32 = vsub.f32 %v48_v23, %v678_v24  ;;  %v130_v33 = vsub.f32 %v48_v23, %v680_v25 }
  0x93   :  { %v255_v38 = vmul.f32 %v133_v30, %v133_v30  ;;  %v256_v39 = vmul.f32 %v134_v31, %v134_v31  ;;  %v251_v45 = vmul.f32 %v129_v32, %v129_v32  ;;  %v252_v46 = vmul.f32 %v130_v33, %v130_v33 }
  0x94   :  { %v63_v26 = vpop.permute.xlu1 %62  ;;  %v53_v27 = vpop.permute.xlu0 %52 }
  0x95   :  { %v135_v40 = vsub.f32 %v63_v26, %v678_v24  ;;  %v136_v41 = vsub.f32 %v63_v26, %v680_v25  ;;  %v131_v43 = vsub.f32 %v53_v27, %v678_v24  ;;  %v132_v44 = vsub.f32 %v53_v27, %v680_v25 }
  0x96   :  { %v701_v53 = vmul.f32 %v688_v42, %v255_v38  ;;  %v704_v54 = vmul.f32 %v688_v42, %v256_v39  ;;  %v709_v61 = vmul.f32 %v688_v42, %v251_v45  ;;  %v712_v62 = vmul.f32 %v688_v42, %v252_v46 }
  0x97   :  { %v257_v55 = vmul.f32 %v135_v40, %v135_v40  ;;  %v258_v56 = vmul.f32 %v136_v41, %v136_v41  ;;  %v253_v57 = vmul.f32 %v131_v43, %v131_v43  ;;  %v254_v58 = vmul.f32 %v132_v44, %v132_v44 }
  0x98   :  { %v73_v34 = vpop.permute.xlu1 %72  ;;  %v68_v35 = vpop.permute.xlu0 %67 }
  0x99   :  { %v139_v59 = vsub.f32 %v73_v34, %v678_v24  ;;  %v140_v60 = vsub.f32 %v73_v34, %v680_v25  ;;  %v137_v63 = vsub.f32 %v68_v35, %v678_v24  ;;  %v138_v0 = vsub.f32 %v68_v35, %v680_v25 }
  0x9a   :  { %v721_v7 = vmul.f32 %v688_v42, %v257_v55  ;;  %v724_v8 = vmul.f32 %v688_v42, %v258_v56  ;;  %v729_v11 = vmul.f32 %v688_v42, %v253_v57  ;;  %v732_v12 = vmul.f32 %v688_v42, %v254_v58 }
  0x9b   :  { %v261_v13 = vmul.f32 %v139_v59, %v139_v59  ;;  %v262_v14 = vmul.f32 %v140_v60, %v140_v60  ;;  %v259_v15 = vmul.f32 %v137_v63, %v137_v63  ;;  %v260_v16 = vmul.f32 %v138_v0, %v138_v0 }
  0x9c   :  { %v83_v47 = vpop.permute.xlu1 %82  ;;  %v78_v48 = vpop.permute.xlu0 %77 }
  0x9d   :  { %v143_v3 = vsub.f32 %v83_v47, %v678_v24  ;;  %v144_v4 = vsub.f32 %v83_v47, %v680_v25  ;;  %v141_v5 = vsub.f32 %v78_v48, %v678_v24  ;;  %v142_v6 = vsub.f32 %v78_v48, %v680_v25 }
  0x9e   :  { %v739_v31 = vmul.f32 %v688_v42, %v261_v13  ;;  %v742_v32 = vmul.f32 %v688_v42, %v262_v14  ;;  %v747_v35 = vmul.f32 %v688_v42, %v259_v15  ;;  %v750_v36 = vmul.f32 %v688_v42, %v260_v16 }
  0x9f   :  { %v265_v21 = vmul.f32 %v143_v3, %v143_v3  ;;  %v266_v22 = vmul.f32 %v144_v4, %v144_v4  ;;  %v263_v23 = vmul.f32 %v141_v5, %v141_v5  ;;  %v264_v26 = vmul.f32 %v142_v6, %v142_v6 }
  0xa0   :  { %v93_v1 = vpop.permute.xlu1 %92  ;;  %v88_v2 = vpop.permute.xlu0 %87 }
  0xa1   :  { %v147_v9 = vsub.f32 %v93_v1, %v678_v24  ;;  %v148_v10 = vsub.f32 %v93_v1, %v680_v25  ;;  %v145_v17 = vsub.f32 %v88_v2, %v678_v24  ;;  %v146_v18 = vsub.f32 %v88_v2, %v680_v25 }
  0xa2   :  { %v753_v40 = vmul.f32 %v688_v42, %v265_v21  ;;  %v756_v41 = vmul.f32 %v688_v42, %v266_v22  ;;  %v759_v46 = vmul.f32 %v688_v42, %v263_v23  ;;  %v762_v47 = vmul.f32 %v688_v42, %v264_v26 }
  0xa3   :  { %v269_v27 = vmul.f32 %v147_v9, %v147_v9  ;;  %v270_v28 = vmul.f32 %v148_v10, %v148_v10  ;;  %v267_v37 = vmul.f32 %v145_v17, %v145_v17  ;;  %v268_v38 = vmul.f32 %v146_v18, %v146_v18 }
  0xa4   :  { %v103_v19 = vpop.permute.xlu1 %102  ;;  %v98_v20 = vpop.permute.xlu0 %97 }
  0xa5   :  { %v151_v29 = vsub.f32 %v103_v19, %v678_v24  ;;  %v152_v30 = vsub.f32 %v103_v19, %v680_v25  ;;  %v149_v33 = vsub.f32 %v98_v20, %v678_v24  ;;  %v150_v34 = vsub.f32 %v98_v20, %v680_v25 }
  0xa6   :  { %v765_v48 = vmul.f32 %v688_v42, %v269_v27  ;;  %v768_v55 = vmul.f32 %v688_v42, %v270_v28  ;;  %v773_v60 = vmul.f32 %v688_v42, %v267_v37  ;;  %v776_v63 = vmul.f32 %v688_v42, %v268_v38 }
  0xa7   :  { %v273_v43 = vmul.f32 %v151_v29, %v151_v29  ;;  %v274_v44 = vmul.f32 %v152_v30, %v152_v30  ;;  %v271_v56 = vmul.f32 %v149_v33, %v149_v33  ;;  %v272_v57 = vmul.f32 %v150_v34, %v150_v34 }
  0xa8   :  { %v108_v39 = vpop.permute.xlu0 %107 }
  0xa9   :  { %v157_v45 = vpop.permute.xlu1 %156  ;;  %v153_v0 = vsub.f32 %v108_v39, %v678_v24  ;;  %v154_v1 = vsub.f32 %v108_v39, %v680_v25  ;;  %v781_v2 = vmul.f32 %v688_v42, %v273_v43  ;;  %v784_v3 = vmul.f32 %v688_v42, %v274_v44 }
  0xaa   :  { %v225_v58 = vsub.f32 %v157_v45, %v692_v49  ;;  %v226_v59 = vsub.f32 %v157_v45, %v694_v50  ;;  %v791_v25 = vmul.f32 %v688_v42, %v271_v56  ;;  %v794_v15 = vmul.f32 %v688_v42, %v272_v57 }
  0xab   :  { %v798_v22 = vmul.f32 %v153_v0, %v153_v0  ;;  %v800_v23 = vmul.f32 %v154_v1, %v154_v1 }
  0xac   :  { %v304_v4 = vmul.f32 %v225_v58, %v225_v58  ;;  %v305_v5 = vmul.f32 %v226_v59, %v226_v59 }
  0xad   :  { %v165_v6 = vpop.permute.xlu1 %164  ;;  %v161_v9 = vpop.permute.xlu0 %160 }
  0xae   :  { %v229_v10 = vsub.f32 %v165_v6, %v692_v49  ;;  %v230_v13 = vsub.f32 %v165_v6, %v694_v50  ;;  %v227_v14 = vsub.f32 %v161_v9, %v692_v49  ;;  %v228_v24 = vsub.f32 %v161_v9, %v694_v50 }
  0xaf   :  { %v331_v16 = vmul.f32 %v696_v51, %v304_v4  ;;  %v332_v17 = vmul.f32 %v696_v51, %v305_v5 }
  0xb0   :  { %v308_v18 = vmul.f32 %v229_v10, %v229_v10  ;;  %v309_v19 = vmul.f32 %v230_v13, %v230_v13  ;;  %v306_v20 = vmul.f32 %v227_v14, %v227_v14  ;;  %v307_v21 = vmul.f32 %v228_v24, %v228_v24 }
  0xb1   :  { %v357_v26 = vadd.f32 %v331_v16, %v709_v61  ;;  %v358_v27 = vadd.f32 %v332_v17, %v712_v62  ;;  %v169_v28 = vpop.permute.xlu1 %168  ;;  %v173_v56 = vpop.permute.xlu0 %172 }
  0xb2   :  { %v335_v29 = vmul.f32 %v696_v51, %v308_v18  ;;  %v336_v30 = vmul.f32 %v696_v51, %v309_v19  ;;  %v333_v33 = vmul.f32 %v696_v51, %v306_v20  ;;  %v334_v34 = vmul.f32 %v696_v51, %v307_v21 }
  0xb3   :  { %v384_v37 = vsub.f32 %v698_v52, %v357_v26  ;;  %v385_v38 = vsub.f32 %v698_v52, %v358_v27  ;;  %v231_v39 = vsub.f32 %v169_v28, %v692_v49  ;;  %v232_v43 = vsub.f32 %v169_v28, %v694_v50 }
  0xb4   :  { %v361_v61 = vadd.f32 %v335_v29, %v701_v53  ;;  %v362_v62 = vadd.f32 %v336_v30, %v704_v54  ;;  %v359_v44 = vadd.f32 %v333_v33, %v729_v11  ;;  %v360_v45 = vadd.f32 %v334_v34, %v732_v12 }
  0xb5   :  { %v410_v57 = vmul.f32 1.442695, %v384_v37  ;;  %v412_v58 = vmul.f32 1.442695, %v385_v38  ;;  %v310_v59 = vmul.f32 %v231_v39, %v231_v39  ;;  %v311_v0 = vmul.f32 %v232_v43, %v232_v43  ;;  %v177_v53 = vpop.permute.xlu1 %176  ;;  %v181_v28 = vpop.permute.xlu0 %180 }
  0xb6   :  { %v388_v1 = vsub.f32 %v698_v52, %v361_v61  ;;  %v389_v4 = vsub.f32 %v698_v52, %v362_v62  ;;  %v386_v5 = vsub.f32 %v698_v52, %v359_v44  ;;  %v387_v6 = vsub.f32 %v698_v52, %v360_v45 }
  0xb7   :  { %517 = vpow2.f32 %v410_v57  ;;  %v337_v54 = vmul.f32 %v696_v51, %v310_v59  ;;  %v338_v11 = vmul.f32 %v696_v51, %v311_v0  ;;  %v233_v12 = vsub.f32 %v173_v56, %v692_v49 }
  0xb8   :  { %519 = vpow2.f32 %v412_v58  ;;  %v418_v9 = vmul.f32 1.442695, %v388_v1  ;;  %v420_v10 = vmul.f32 1.442695, %v389_v4  ;;  %v414_v13 = vmul.f32 1.442695, %v386_v5 }
  0xb9   :  { %v416_v14 = vmul.f32 1.442695, %v387_v6  ;;  %v363_v24 = vadd.f32 %v337_v54, %v721_v7  ;;  %v364_v16 = vadd.f32 %v338_v11, %v724_v8  ;;  %v234_v17 = vsub.f32 %v173_v56, %v694_v50  ;;  %v185_v30 = vpop.permute.xlu1 %184  ;;  %v189_v11 = vpop.permute.xlu0 %188 }
  0xba   :  { %521 = vpow2.f32 %v418_v9  ;;  %v312_v18 = vmul.f32 %v233_v12, %v233_v12  ;;  %v235_v19 = vsub.f32 %v177_v53, %v692_v49  ;;  %v236_v20 = vsub.f32 %v177_v53, %v694_v50 }
  0xbb   :  { %523 = vpow2.f32 %v420_v10  ;;  %v390_v21 = vsub.f32 %v698_v52, %v363_v24  ;;  %v391_v26 = vsub.f32 %v698_v52, %v364_v16  ;;  %v313_v27 = vmul.f32 %v234_v17, %v234_v17 }
  0xbc   :  { %525 = vpow2.f32 %v414_v13  ;;  %v339_v7 = vmul.f32 %v696_v51, %v312_v18  ;;  %v314_v29 = vmul.f32 %v235_v19, %v235_v19  ;;  %v315_v8 = vmul.f32 %v236_v20, %v236_v20 }
  0xbd   :  { %527 = vpow2.f32 %v416_v14  ;;  %v422_v33 = vmul.f32 1.442695, %v390_v21  ;;  %v424_v34 = vmul.f32 1.442695, %v391_v26  ;;  %v340_v37 = vmul.f32 %v696_v51, %v313_v27  ;;  %v193_v20 = vpop.permute.xlu1 %192 }
  0xbe   :  { %v365_v38 = vadd.f32 %v339_v7, %v747_v35  ;;  %v341_v39 = vmul.f32 %v696_v51, %v314_v29  ;;  %v342_v43 = vmul.f32 %v696_v51, %v315_v8  ;;  %v237_v61 = vsub.f32 %v181_v28, %v692_v49 }
  0xbf   :  { %529 = vpow2.f32 %v422_v33  ;;  %v366_v62 = vadd.f32 %v340_v37, %v750_v36  ;;  %v238_v44 = vsub.f32 %v181_v28, %v694_v50  ;;  %v239_v45 = vsub.f32 %v185_v30, %v692_v49 }
  0xc0   :  { %531 = vpow2.f32 %v424_v34  ;;  %v392_v56 = vsub.f32 %v698_v52, %v365_v38  ;;  %v367_v57 = vadd.f32 %v341_v39, %v739_v31  ;;  %v368_v35 = vadd.f32 %v342_v43, %v742_v32  ;;  %v197_v34 = vpop.permute.xlu0 %196 }
  0xc1   :  { %v518_v58 = vpop.eup %517  ;;  %v393_v59 = vsub.f32 %v698_v52, %v366_v62  ;;  %v316_v0 = vmul.f32 %v237_v61, %v237_v61  ;;  %v317_v1 = vmul.f32 %v238_v44, %v238_v44  ;;  %v240_v4 = vsub.f32 %v185_v30, %v694_v50 }
  0xc2   :  { %v520_v5 = vpop.eup %519  ;;  %462 = vst [vmem:[#allocation5] sm:$0xff] %v518_v58  ;;  %v426_v36 = vmul.f32 1.442695, %v392_v56  ;;  %v394_v6 = vsub.f32 %v698_v52, %v367_v57  ;;  %v395_v53 = vsub.f32 %v698_v52, %v368_v35  ;;  %v318_v54 = vmul.f32 %v239_v45, %v239_v45 }
  0xc3   :  { %463 = vst [vmem:[#allocation5 + $0x8] sm:$0xff] %v520_v5  ;;  %v428_v31 = vmul.f32 1.442695, %v393_v59  ;;  %v343_v32 = vmul.f32 %v696_v51, %v316_v0  ;;  %v344_v12 = vmul.f32 %v696_v51, %v317_v1  ;;  %v319_v9 = vmul.f32 %v240_v4, %v240_v4  ;;  %v201_v4 = vpop.permute.xlu1 %200 }
  0xc4   :  { %v522_v10 = vpop.eup %521  ;;  %533 = vpow2.f32 %v426_v36  ;;  %v430_v13 = vmul.f32 1.442695, %v394_v6  ;;  %v432_v14 = vmul.f32 1.442695, %v395_v53  ;;  %v345_v24 = vmul.f32 %v696_v51, %v318_v54 }
  0xc5   :  { %v524_v16 = vpop.eup %523  ;;  %466 = vst [vmem:[#allocation5 + $0x20] sm:$0xff] %v522_v10  ;;  %535 = vpow2.f32 %v428_v31  ;;  %v369_v17 = vadd.f32 %v343_v32, %v759_v46  ;;  %v370_v18 = vadd.f32 %v344_v12, %v762_v47  ;;  %v346_v19 = vmul.f32 %v696_v51, %v319_v9  ;;  %v205_v10 = vpop.permute.xlu0 %204 }
  0xc6   :  { %v526_v21 = vpop.eup %525  ;;  %467 = vst [vmem:[#allocation5 + $0x28] sm:$0xff] %v524_v16  ;;  %537 = vpow2.f32 %v430_v13  ;;  %v371_v26 = vadd.f32 %v345_v24, %v753_v40  ;;  %v241_v27 = vsub.f32 %v189_v11, %v692_v49  ;;  %v242_v28 = vsub.f32 %v189_v11, %v694_v50 }
  0xc7   :  { %v528_v7 = vpop.eup %527  ;;  %464 = vst [vmem:[#allocation5 + $0x10] sm:$0xff] %v526_v21  ;;  %539 = vpow2.f32 %v432_v14  ;;  %v396_v29 = vsub.f32 %v698_v52, %v369_v17  ;;  %v397_v46 = vsub.f32 %v698_v52, %v370_v18  ;;  %v372_v47 = vadd.f32 %v346_v19, %v756_v41 }
  0xc8   :  { %465 = vst [vmem:[#allocation5 + $0x18] sm:$0xff] %v528_v7  ;;  %v398_v8 = vsub.f32 %v698_v52, %v371_v26  ;;  %v320_v30 = vmul.f32 %v241_v27, %v241_v27  ;;  %v321_v33 = vmul.f32 %v242_v28, %v242_v28  ;;  %v243_v40 = vsub.f32 %v193_v20, %v692_v49 }
  0xc9   :  { %v530_v37 = vpop.eup %529  ;;  %v434_v38 = vmul.f32 1.442695, %v396_v29  ;;  %v436_v39 = vmul.f32 1.442695, %v397_v46  ;;  %v399_v43 = vsub.f32 %v698_v52, %v372_v47  ;;  %v244_v61 = vsub.f32 %v193_v20, %v694_v50 }
  0xca   :  { %v532_v62 = vpop.eup %531  ;;  %468 = vst [vmem:[#allocation5 + $0x30] sm:$0xff] %v530_v37  ;;  %v438_v44 = vmul.f32 1.442695, %v398_v8  ;;  %v347_v41 = vmul.f32 %v696_v51, %v320_v30  ;;  %v348_v45 = vmul.f32 %v696_v51, %v321_v33  ;;  %v322_v56 = vmul.f32 %v243_v40, %v243_v40 }
  0xcb   :  { %469 = vst [vmem:[#allocation5 + $0x38] sm:$0xff] %v532_v62  ;;  %541 = vpow2.f32 %v434_v38  ;;  %v440_v57 = vmul.f32 1.442695, %v399_v43  ;;  %v323_v35 = vmul.f32 %v244_v61, %v244_v61  ;;  %v245_v58 = vsub.f32 %v197_v34, %v692_v49 }
  0xcc   :  { %543 = vpow2.f32 %v436_v39  ;;  %v373_v59 = vadd.f32 %v347_v41, %v773_v60  ;;  %v374_v0 = vadd.f32 %v348_v45, %v776_v63  ;;  %v349_v1 = vmul.f32 %v696_v51, %v322_v56 }
  0xcd   :  { %545 = vpow2.f32 %v438_v44  ;;  %v350_v5 = vmul.f32 %v696_v51, %v323_v35  ;;  %v246_v36 = vsub.f32 %v197_v34, %v694_v50  ;;  %v324_v6 = vmul.f32 %v245_v58, %v245_v58 }
  0xce   :  { %v534_v53 = vpop.eup %533  ;;  %547 = vpow2.f32 %v440_v57  ;;  %v400_v54 = vsub.f32 %v698_v52, %v373_v59  ;;  %v401_v11 = vsub.f32 %v698_v52, %v374_v0  ;;  %v375_v31 = vadd.f32 %v349_v1, %v765_v48 }
  0xcf   :  { %v536_v60 = vpop.eup %535  ;;  %470 = vst [vmem:[#allocation5 + $0x40] sm:$0xff] %v534_v53  ;;  %v376_v63 = vadd.f32 %v350_v5, %v768_v55  ;;  %v325_v32 = vmul.f32 %v246_v36, %v246_v36  ;;  %v351_v12 = vmul.f32 %v696_v51, %v324_v6  ;;  %v247_v9 = vsub.f32 %v201_v4, %v692_v49 }
  0xd0   :  { %v538_v13 = vpop.eup %537  ;;  %471 = vst [vmem:[#allocation5 + $0x48] sm:$0xff] %v536_v60  ;;  %v442_v14 = vmul.f32 1.442695, %v400_v54  ;;  %v444_v24 = vmul.f32 1.442695, %v401_v11  ;;  %v402_v16 = vsub.f32 %v698_v52, %v375_v31  ;;  %v248_v17 = vsub.f32 %v201_v4, %v694_v50 }
  0xd1   :  { %v540_v18 = vpop.eup %539  ;;  %472 = vst [vmem:[#allocation5 + $0x50] sm:$0xff] %v538_v13  ;;  %v403_v48 = vsub.f32 %v698_v52, %v376_v63  ;;  %v352_v55 = vmul.f32 %v696_v51, %v325_v32  ;;  %v377_v19 = vadd.f32 %v351_v12, %v791_v25  ;;  %v326_v20 = vmul.f32 %v247_v9, %v247_v9 }
  0xd2   :  { %473 = vst [vmem:[#allocation5 + $0x58] sm:$0xff] %v540_v18  ;;  %549 = vpow2.f32 %v442_v14  ;;  %v446_v21 = vmul.f32 1.442695, %v402_v16  ;;  %v327_v26 = vmul.f32 %v248_v17, %v248_v17  ;;  %v249_v27 = vsub.f32 %v205_v10, %v692_v49 }
  0xd3   :  { %551 = vpow2.f32 %v444_v24  ;;  %v448_v28 = vmul.f32 1.442695, %v403_v48  ;;  %v378_v7 = vadd.f32 %v352_v55, %v794_v15  ;;  %v404_v29 = vsub.f32 %v698_v52, %v377_v19 }
  0xd4   :  { %553 = vpow2.f32 %v446_v21  ;;  %v353_v46 = vmul.f32 %v696_v51, %v326_v20  ;;  %v354_v47 = vmul.f32 %v696_v51, %v327_v26  ;;  %v250_v25 = vsub.f32 %v205_v10, %v694_v50 }
  0xd5   :  { %v542_v8 = vpop.eup %541  ;;  %555 = vpow2.f32 %v448_v28  ;;  %v405_v30 = vsub.f32 %v698_v52, %v378_v7  ;;  %v450_v33 = vmul.f32 1.442695, %v404_v29  ;;  %v328_v40 = vmul.f32 %v249_v27, %v249_v27 }
  0xd6   :  { %v544_v49 = vpop.eup %543  ;;  %474 = vst [vmem:[#allocation5 + $0x60] sm:$0xff] %v542_v8  ;;  %v379_v34 = vadd.f32 %v353_v46, %v781_v2  ;;  %v380_v15 = vadd.f32 %v354_v47, %v784_v3  ;;  %v329_v37 = vmul.f32 %v250_v25, %v250_v25  ;;  %v302_v39 = vmul.f32 %v688_v42, %v798_v22 }
  0xd7   :  { %v546_v38 = vpop.eup %545  ;;  %475 = vst [vmem:[#allocation5 + $0x68] sm:$0xff] %v544_v49  ;;  %557 = vpow2.f32 %v450_v33  ;;  %v452_v50 = vmul.f32 1.442695, %v405_v30  ;;  %v355_v43 = vmul.f32 %v696_v51, %v328_v40  ;;  %v303_v62 = vmul.f32 %v688_v42, %v800_v23 }
  0xd8   :  { %v548_v61 = vpop.eup %547  ;;  %476 = vst [vmem:[#allocation5 + $0x70] sm:$0xff] %v546_v38  ;;  %v406_v44 = vsub.f32 %v698_v52, %v379_v34  ;;  %v407_v2 = vsub.f32 %v698_v52, %v380_v15  ;;  %v356_v3 = vmul.f32 %v696_v51, %v329_v37 }
  0xd9   :  { %477 = vst [vmem:[#allocation5 + $0x78] sm:$0xff] %v548_v61  ;;  %559 = vpow2.f32 %v452_v50  ;;  %v381_v41 = vadd.f32 %v355_v43, %v302_v39 }
  0xda   :  { %v454_v22 = vmul.f32 1.442695, %v406_v44  ;;  %v456_v45 = vmul.f32 1.442695, %v407_v2  ;;  %v382_v56 = vadd.f32 %v356_v3, %v303_v62 }
  0xdb   :  { %v408_v57 = vsub.f32 %v698_v52, %v381_v41 }
  0xdc   :  { %v550_v35 = vpop.eup %549  ;;  %561 = vpow2.f32 %v454_v22  ;;  %v409_v58 = vsub.f32 %v698_v52, %v382_v56 }
  0xdd   :  { %v552_v42 = vpop.eup %551  ;;  %478 = vst [vmem:[#allocation5 + $0x80] sm:$0xff] %v550_v35  ;;  %563 = vpow2.f32 %v456_v45  ;;  %v458_v23 = vmul.f32 1.442695, %v408_v57 }
  0xde   :  { %v554_v59 = vpop.eup %553  ;;  %479 = vst [vmem:[#allocation5 + $0x88] sm:$0xff] %v552_v42  ;;  %v460_v0 = vmul.f32 1.442695, %v409_v58 }
  0xdf   :  { %v556_v51 = vpop.eup %555  ;;  %480 = vst [vmem:[#allocation5 + $0x90] sm:$0xff] %v554_v59  ;;  %565 = vpow2.f32 %v458_v23 }
  0xe0   :  { %481 = vst [vmem:[#allocation5 + $0x98] sm:$0xff] %v556_v51  ;;  %567 = vpow2.f32 %v460_v0 }
  0xe1   :  { %v558_v1 = vpop.eup %557 }
  0xe2   :  { %482 = vst [vmem:[#allocation5 + $0xa0] sm:$0xff] %v558_v1 }
  0xe3   :  { %v560_v4 = vpop.eup %559 }
  0xe4   :  { %483 = vst [vmem:[#allocation5 + $0xa8] sm:$0xff] %v560_v4 }
  0xe6   :  { %v562_v5 = vpop.eup %561 }
  0xe7   :  { %v564_v52 = vpop.eup %563  ;;  %484 = vst [vmem:[#allocation5 + $0xb0] sm:$0xff] %v562_v5 }
  0xe8   :  { %485 = vst [vmem:[#allocation5 + $0xb8] sm:$0xff] %v564_v52 }
  0xe9   :  { %v566_v36 = vpop.eup %565 }
  0xea   :  { %v568_v6 = vpop.eup %567  ;;  %486 = vst [vmem:[#allocation5 + $0xc0] sm:$0xff] %v566_v36 }
  0xeb   :  { %487 = vst [vmem:[#allocation5 + $0xc8] sm:$0xff] %v568_v6 }
  0xec   :  { %592 = shalt.err (!%p589_p9)
}
  0xed   :  { %s593_s22 = scalar_lea.hbm %s915_s3, 3328 }
  0xee   :  { %p594_p10 = scmp.ne.s32.totalorder %s915_s3, %s593_s22  ;;  %p597_p11 = scmp.lt.u32.totalorder %s593_s22, %s915_s3 }
  0xf0   :  { %p599_p12 = pnand %p597_p11, %p594_p10 }
  0xf2   :  { %602 = shalt.err (!%p599_p12)
}
  0xf3   :  { %s611_s27 = smov 256   ;;  %s612_s28 = smov 16  }
  0xf4   :  { %499 = dma.vmem_to_hbm [thread:$0]  %s494_s19, 3328, %s915_s3, [#allocation3], %s611_s27, %s611_s27, %s612_s28  }
  0xf5   :  { %605 = dma.done.wait [#allocation3], 3328  }
  0xf6   :  { %606 = vsyncadd [#allocation3], 4294963968 }
  0xf7   :  { %503 = vsyncpa [#allocation3], 1 }
  0xf8   :  { %504 = vsyncpa [#allocation4], 1 }

</bundles_post_ra>
